<compile_context>
chip_gen: v5e
topology: v5e:2x2
jax: 0.10.0
libtpu: 0.0.40
codegen_flags: <defaults>
</compile_context>

<pallas_src>
import jax
import jax.numpy as jnp
from jax import lax
from jax.experimental import pallas as pl
from jax.experimental.pallas import tpu as pltpu

EPS = 1e-5


def basic_block_kernel(x_ref, w1_ref, g1_ref, b1_ref, w2_ref, g2_ref, b2_ref,
                       s_ref, st_ref, out_ref, mid_ref):
    N, Hp, WpC = x_ref.shape                 # (N, H+2, (W+2)*C) padded rows
    H = Hp - 2
    C = s_ref.shape[1]
    W = WpC // C - 2
    M = N * H
    inv_count = 1.0 / float(N * H * W)       # BN normalizes over (N, H, W)

    S = s_ref[...]                           # ((W+2)*C, C)  real-column selector
    ST = st_ref[...]                         # (C, (W+2)*C)  channel -> column bcast

    def conv3x3_rows(src_ref, w_ref):
        # One K=(W+2)*C MXU contraction per kernel row dy (3 total), taps dx
        # and all W output positions folded into the banded weight matrix.
        acc = jnp.dot(src_ref[:, 0:H, :].reshape(M, src_ref.shape[-1]), w_ref[0],
                      preferred_element_type=jnp.float32)
        for dy in (1, 2):
            rows = src_ref[:, dy:dy + H, :].reshape(M, src_ref.shape[-1])
            acc = acc + jnp.dot(rows, w_ref[dy],
                                preferred_element_type=jnp.float32)
        return acc                           # (M, (W+2)*C); padding columns are 0

    def batchnorm(acc, g, b):
        # Per-channel batch stats, fused single pass: var = E[x^2] - mean^2.
        ch_sum = jnp.sum(jnp.dot(acc, S, preferred_element_type=jnp.float32),
                         axis=0, keepdims=True)                       # (1, C)
        ch_sqs = jnp.sum(jnp.dot(acc * acc, S, preferred_element_type=jnp.float32),
                         axis=0, keepdims=True)                       # (1, C)
        mean = ch_sum * inv_count
        var = ch_sqs * inv_count - mean * mean
        scale_c = g * lax.rsqrt(var + EPS)                            # (1, C)
        shift_c = b - mean * scale_c                                  # (1, C)
        # Broadcast per-channel scale/shift back to the lane-dense columns
        # (zeros at the padding columns so padded positions stay exactly 0).
        scale = jnp.dot(scale_c, ST, preferred_element_type=jnp.float32)
        shift = jnp.dot(shift_c, ST, preferred_element_type=jnp.float32)
        return acc * scale + shift

    # ---- conv1 -> bn1 -> relu (result rows are already W-padded) ----
    hid = jnp.maximum(batchnorm(conv3x3_rows(x_ref, w1_ref),
                                g1_ref[...], b1_ref[...]), 0.0)       # (M, WpC)

    # ---- H-halo for conv2: zero only the two border rows, interior once ----
    zero_row = jnp.zeros((N, 1, WpC), jnp.float32)
    mid_ref[:, 0:1, :] = zero_row
    mid_ref[:, Hp - 1:Hp, :] = zero_row
    mid_ref[:, 1:H + 1, :] = hid.reshape(N, H, WpC)

    # ---- conv2 -> bn2 -> + identity residual -> relu ----
    out = batchnorm(conv3x3_rows(mid_ref, w2_ref), g2_ref[...], b2_ref[...])
    residual = x_ref[:, 1:H + 1, :].reshape(M, WpC)
    out_ref[...] = jnp.maximum(out + residual, 0.0)


def _band_conv_weights(w9, cin, cout, W):
    """Banded per-dy weight matrices for a 3x3 / stride 1 / pad 1 conv acting on
    W-padded flattened rows.  w9: (9, cin, cout) tap-major (ky*3 + kx).
    Returns (3, (W+2)*cin, (W+2)*cout); padding output columns have zero weights."""
    Wp = W + 2
    wq = jnp.arange(Wp)[:, None]             # padded input position
    wo = jnp.arange(Wp)[None, :]             # padded output position
    valid_out = (wo >= 1) & (wo <= W)
    bands = []
    for dy in range(3):
        b4 = jnp.zeros((Wp, cin, Wp, cout), jnp.float32)
        for dx in range(3):
            hit = ((wq == wo - 1 + dx) & valid_out).astype(jnp.float32)   # (Wp, Wp)
            b4 = b4 + hit[:, None, :, None] * w9[dy * 3 + dx][None, :, None, :]
        bands.append(b4.reshape(Wp * cin, Wp * cout))
    return jnp.stack(bands, axis=0)


def _channel_selectors(c, W):
    """S ((W+2)*c, c): sums real (non-padding) columns per channel.
       S^T (c, (W+2)*c): broadcasts per-channel scalars back to columns
       (zeros at padding columns)."""
    Wp = W + 2
    valid = ((jnp.arange(Wp) >= 1) & (jnp.arange(Wp) <= W)).astype(jnp.float32)
    s = (valid[:, None, None] * jnp.eye(c, dtype=jnp.float32)[None]).reshape(Wp * c, c)
    return s, s.T


def basic_block_pallas(x_nchw, params):
    """x_nchw: (N, C, H, W) float32.  params = (w1, g1, b1, w2, g2, b2) with
    conv weights of shape (9, Cin, Cout), tap-major (ky*3 + kx).  Matches
    BasicBlock(stride=1, atrous=1, downsample=None) with BN in training mode."""
    w1, g1, b1, w2, g2, b2 = params
    N, C, H, W = x_nchw.shape
    Cout = w1.shape[-1]
    assert C == w1.shape[1] == Cout == w2.shape[1] == w2.shape[2], (
        "identity residual requires in_chans == out_chans")
    # TODO(synk): stride>1 / atrous>1 / downsample variants of BasicBlock are not handled.

    Hp, Wp = H + 2, W + 2

    # NCHW -> lane-dense padded rows (N, H+2, (W+2)*C).  The zero padding fuses
    # into the one transpose/reshape relayout XLA must do anyway (no extra HBM
    # round-trip compared to passing unpadded NHWC).
    x_rows = jnp.pad(jnp.transpose(x_nchw, (0, 2, 3, 1)).astype(jnp.float32),
                     ((0, 0), (1, 1), (1, 1), (0, 0))).reshape(N, Hp, Wp * C)

    # TODO(synk): cast activations / banded weights to bf16 for the MXU on
    # v6e/v7x (keep f32 accumulation); kept f32 here for exact parity with the
    # f32 PyTorch reference at the 2e-3 tolerance.
    bw1 = _band_conv_weights(w1, C, Cout, W)
    bw2 = _band_conv_weights(w2, Cout, Cout, W)
    sel, sel_t = _channel_selectors(Cout, W)

    # TODO(synk): for large N*H*W, tile over row blocks (halo=1) with a grid,
    # keep BN statistics global via cross-tile sum/sumsq accumulators (or a
    # stats pass + normalize pass), and mark the row axis "parallel" so the
    # work shards across v7x's two TensorCores.
    vmem = pl.BlockSpec(memory_space=pltpu.MemorySpace.VMEM)
    out_rows = pl.pallas_call(
        basic_block_kernel,
        out_shape=jax.ShapeDtypeStruct((N * H, Wp * Cout), jnp.float32),
        in_specs=[vmem] * 9,
        out_specs=vmem,
        scratch_shapes=[pltpu.VMEM((N, Hp, Wp * Cout), jnp.float32)],
        compiler_params=pltpu.CompilerParams(vmem_limit_bytes=32 * 1024 * 1024),
    )(x_rows, bw1, g1.reshape(1, -1), b1.reshape(1, -1),
      bw2, g2.reshape(1, -1), b2.reshape(1, -1), sel, sel_t)

    out_nhwc = out_rows.reshape(N, H, Wp, Cout)[:, :, 1:W + 1, :]
    return jnp.transpose(out_nhwc, (0, 3, 1, 2))


def basic_block_ref(x_nchw, params):
    """Pure-JAX reference (matches PyTorch BasicBlock.forward in training mode)."""
    w1, g1, b1, w2, g2, b2 = params
    x = jnp.transpose(x_nchw, (0, 2, 3, 1)).astype(jnp.float32)

    def conv(inp, w):
        wk = w.reshape(3, 3, w.shape[1], w.shape[2])  # HWIO
        return lax.conv_general_dilated(
            inp, wk, window_strides=(1, 1), padding=((1, 1), (1, 1)),
            dimension_numbers=('NHWC', 'HWIO', 'NHWC'))

    def bn(y, g, b):
        m = jnp.mean(y, axis=(0, 1, 2))
        v = jnp.mean((y - m) ** 2, axis=(0, 1, 2))
        return (y - m) * lax.rsqrt(v + EPS) * g + b

    h = jnp.maximum(bn(conv(x, w1), g1, b1), 0.0)
    o = jnp.maximum(bn(conv(h, w2), g2, b2) + x, 0.0)
    return jnp.transpose(o, (0, 3, 1, 2))


if __name__ == "__main__":
    # Small shapes consistent with the module: N=2, C=4, H=W=16
    # (in_chans == out_chans, stride=1, atrous=1, downsample=None).
    N, C, H, W = 2, 4, 16, 16
    key = jax.random.PRNGKey(0)
    kx, kw1, kw2, kg1, kb1, kg2, kb2 = jax.random.split(key, 7)

    x = jax.random.normal(kx, (N, C, H, W), jnp.float32)
    # conv weights stored tap-major (ky*3+kx, Cin, Cout); bias=False as in conv3x3.
    w1 = 0.1 * jax.random.normal(kw1, (9, C, C), jnp.float32)
    w2 = 0.1 * jax.random.normal(kw2, (9, C, C), jnp.float32)
    g1 = 1.0 + 0.1 * jax.random.normal(kg1, (C,), jnp.float32)
    b1 = 0.1 * jax.random.normal(kb1, (C,), jnp.float32)
    g2 = 1.0 + 0.1 * jax.random.normal(kg2, (C,), jnp.float32)
    b2 = 0.1 * jax.random.normal(kb2, (C,), jnp.float32)
    params = (w1, g1, b1, w2, g2, b2)

    out = jax.block_until_ready(basic_block_pallas(x, params))
    ref = jax.block_until_ready(basic_block_ref(x, params))

    assert out.shape == (N, C, H, W), out.shape
    max_err = float(jnp.max(jnp.abs(out - ref)))
    assert jnp.allclose(out, ref, atol=2e-3, rtol=2e-3), max_err
    print("KERNEL_OK")
</pallas_src>

<mosaic_0001>
module attributes {stable_mosaic.version = 11 : i64} {
  func.func @basic_block_kernel(%arg0: memref<2x18x72xf32, #tpu.memory_space<vmem>>, %arg1: memref<3x72x72xf32, #tpu.memory_space<vmem>>, %arg2: memref<1x4xf32, #tpu.memory_space<vmem>>, %arg3: memref<1x4xf32, #tpu.memory_space<vmem>>, %arg4: memref<3x72x72xf32, #tpu.memory_space<vmem>>, %arg5: memref<1x4xf32, #tpu.memory_space<vmem>>, %arg6: memref<1x4xf32, #tpu.memory_space<vmem>>, %arg7: memref<72x4xf32, #tpu.memory_space<vmem>>, %arg8: memref<4x72xf32, #tpu.memory_space<vmem>>, %arg9: memref<32x72xf32, #tpu.memory_space<vmem>>, %arg10: memref<2x18x72xf32, #tpu.memory_space<vmem>>) attributes {dimension_semantics = [], scalar_prefetch = 0 : i64, scratch_operands = 1 : i64, tpu.core_type = #tpu.core_type<tc>} {
    %c0 = arith.constant 0 : index
    %c0_0 = arith.constant 0 : index
    %0 = vector.load %arg7[%c0, %c0_0] : memref<72x4xf32, #tpu.memory_space<vmem>>, vector<72x4xf32>
    %c0_1 = arith.constant 0 : index
    %c0_2 = arith.constant 0 : index
    %1 = vector.load %arg8[%c0_1, %c0_2] : memref<4x72xf32, #tpu.memory_space<vmem>>, vector<4x72xf32>
    %c0_3 = arith.constant 0 : index
    %c0_4 = arith.constant 0 : index
    %c0_5 = arith.constant 0 : index
    %2 = vector.load %arg0[%c0_3, %c0_4, %c0_5] : memref<2x18x72xf32, #tpu.memory_space<vmem>>, vector<2x16x72xf32>
    %3 = vector.shape_cast %2 : vector<2x16x72xf32> to vector<32x72xf32>
    %c0_6 = arith.constant 0 : index
    %c0_7 = arith.constant 0 : index
    %c0_8 = arith.constant 0 : index
    %4 = vector.load %arg1[%c0_6, %c0_7, %c0_8] : memref<3x72x72xf32, #tpu.memory_space<vmem>>, vector<1x72x72xf32>
    %5 = vector.shape_cast %4 : vector<1x72x72xf32> to vector<72x72xf32>
    %cst = arith.constant dense<0.000000e+00> : vector<32x72xf32>
    %6 = tpu.matmul %3, %5, %cst {dimension_numbers = #tpu.dot_dimension_numbers<[1], [0], [0], [1], [0, 0, 1, 1], [], []>} : vector<32x72xf32>, vector<72x72xf32>, vector<32x72xf32> -> vector<32x72xf32>
    %c0_9 = arith.constant 0 : index
    %c1 = arith.constant 1 : index
    %c0_10 = arith.constant 0 : index
    %7 = vector.load %arg0[%c0_9, %c1, %c0_10] : memref<2x18x72xf32, #tpu.memory_space<vmem>>, vector<2x16x72xf32>
    %8 = vector.shape_cast %7 : vector<2x16x72xf32> to vector<32x72xf32>
    %c1_11 = arith.constant 1 : index
    %c0_12 = arith.constant 0 : index
    %c0_13 = arith.constant 0 : index
    %9 = vector.load %arg1[%c1_11, %c0_12, %c0_13] : memref<3x72x72xf32, #tpu.memory_space<vmem>>, vector<1x72x72xf32>
    %10 = vector.shape_cast %9 : vector<1x72x72xf32> to vector<72x72xf32>
    %cst_14 = arith.constant dense<0.000000e+00> : vector<32x72xf32>
    %11 = tpu.matmul %8, %10, %cst_14 {dimension_numbers = #tpu.dot_dimension_numbers<[1], [0], [0], [1], [0, 0, 1, 1], [], []>} : vector<32x72xf32>, vector<72x72xf32>, vector<32x72xf32> -> vector<32x72xf32>
    %12 = arith.addf %6, %11 : vector<32x72xf32>
    %c0_15 = arith.constant 0 : index
    %c2 = arith.constant 2 : index
    %c0_16 = arith.constant 0 : index
    %13 = vector.load %arg0[%c0_15, %c2, %c0_16] : memref<2x18x72xf32, #tpu.memory_space<vmem>>, vector<2x16x72xf32>
    %14 = vector.shape_cast %13 : vector<2x16x72xf32> to vector<32x72xf32>
    %c2_17 = arith.constant 2 : index
    %c0_18 = arith.constant 0 : index
    %c0_19 = arith.constant 0 : index
    %15 = vector.load %arg1[%c2_17, %c0_18, %c0_19] : memref<3x72x72xf32, #tpu.memory_space<vmem>>, vector<1x72x72xf32>
    %16 = vector.shape_cast %15 : vector<1x72x72xf32> to vector<72x72xf32>
    %cst_20 = arith.constant dense<0.000000e+00> : vector<32x72xf32>
    %17 = tpu.matmul %14, %16, %cst_20 {dimension_numbers = #tpu.dot_dimension_numbers<[1], [0], [0], [1], [0, 0, 1, 1], [], []>} : vector<32x72xf32>, vector<72x72xf32>, vector<32x72xf32> -> vector<32x72xf32>
    %18 = arith.addf %12, %17 : vector<32x72xf32>
    %c0_21 = arith.constant 0 : index
    %c0_22 = arith.constant 0 : index
    %19 = vector.load %arg2[%c0_21, %c0_22] : memref<1x4xf32, #tpu.memory_space<vmem>>, vector<1x4xf32>
    %c0_23 = arith.constant 0 : index
    %c0_24 = arith.constant 0 : index
    %20 = vector.load %arg3[%c0_23, %c0_24] : memref<1x4xf32, #tpu.memory_space<vmem>>, vector<1x4xf32>
    %cst_25 = arith.constant dense<0.000000e+00> : vector<32x4xf32>
    %21 = tpu.matmul %18, %0, %cst_25 {dimension_numbers = #tpu.dot_dimension_numbers<[1], [0], [0], [1], [0, 0, 1, 1], [], []>} : vector<32x72xf32>, vector<72x4xf32>, vector<32x4xf32> -> vector<32x4xf32>
    %cst_26 = arith.constant dense<0.000000e+00> : vector<4xf32>
    %22 = vector.multi_reduction <add>, %21, %cst_26 [0] : vector<32x4xf32> to vector<4xf32>
    %23 = vector.shape_cast %22 : vector<4xf32> to vector<1x4xf32>
    %24 = arith.mulf %18, %18 : vector<32x72xf32>
    %cst_27 = arith.constant dense<0.000000e+00> : vector<32x4xf32>
    %25 = tpu.matmul %24, %0, %cst_27 {dimension_numbers = #tpu.dot_dimension_numbers<[1], [0], [0], [1], [0, 0, 1, 1], [], []>} : vector<32x72xf32>, vector<72x4xf32>, vector<32x4xf32> -> vector<32x4xf32>
    %cst_28 = arith.constant dense<0.000000e+00> : vector<4xf32>
    %26 = vector.multi_reduction <add>, %25, %cst_28 [0] : vector<32x4xf32> to vector<4xf32>
    %27 = vector.shape_cast %26 : vector<4xf32> to vector<1x4xf32>
    %cst_29 = arith.constant 0.001953125 : f32
    %28 = vector.broadcast %cst_29 : f32 to vector<1x4xf32>
    %29 = arith.mulf %23, %28 : vector<1x4xf32>
    %cst_30 = arith.constant 0.001953125 : f32
    %30 = vector.broadcast %cst_30 : f32 to vector<1x4xf32>
    %31 = arith.mulf %27, %30 : vector<1x4xf32>
    %32 = arith.mulf %29, %29 : vector<1x4xf32>
    %33 = arith.subf %31, %32 : vector<1x4xf32>
    %cst_31 = arith.constant 9.99999974E-6 : f32
    %34 = vector.broadcast %cst_31 : f32 to vector<1x4xf32>
    %35 = arith.addf %33, %34 : vector<1x4xf32>
    %36 = math.rsqrt %35 : vector<1x4xf32>
    %37 = arith.mulf %19, %36 : vector<1x4xf32>
    %38 = arith.mulf %29, %37 : vector<1x4xf32>
    %39 = arith.subf %20, %38 : vector<1x4xf32>
    %cst_32 = arith.constant dense<0.000000e+00> : vector<1x72xf32>
    %40 = tpu.matmul %37, %1, %cst_32 {dimension_numbers = #tpu.dot_dimension_numbers<[1], [0], [0], [1], [0, 0, 1, 1], [], []>} : vector<1x4xf32>, vector<4x72xf32>, vector<1x72xf32> -> vector<1x72xf32>
    %cst_33 = arith.constant dense<0.000000e+00> : vector<1x72xf32>
    %41 = tpu.matmul %39, %1, %cst_33 {dimension_numbers = #tpu.dot_dimension_numbers<[1], [0], [0], [1], [0, 0, 1, 1], [], []>} : vector<1x4xf32>, vector<4x72xf32>, vector<1x72xf32> -> vector<1x72xf32>
    %42 = vector.broadcast %40 : vector<1x72xf32> to vector<32x72xf32>
    %43 = arith.mulf %18, %42 : vector<32x72xf32>
    %44 = vector.broadcast %41 : vector<1x72xf32> to vector<32x72xf32>
    %45 = arith.addf %43, %44 : vector<32x72xf32>
    %cst_34 = arith.constant 0.000000e+00 : f32
    %46 = vector.broadcast %cst_34 : f32 to vector<32x72xf32>
    %47 = arith.maximumf %45, %46 : vector<32x72xf32>
    %cst_35 = arith.constant 0.000000e+00 : f32
    %48 = vector.broadcast %cst_35 : f32 to vector<2x1x72xf32>
    %c0_36 = arith.constant 0 : index
    %c0_37 = arith.constant 0 : index
    %c0_38 = arith.constant 0 : index
    %49 = vector.load %arg10[%c0_36, %c0_37, %c0_38] : memref<2x18x72xf32, #tpu.memory_space<vmem>>, vector<2x1x72xf32>
    tpu.vector_store %arg10[%c0_36, %c0_37, %c0_38], %48 {strides = array<i32>} : memref<2x18x72xf32, #tpu.memory_space<vmem>>, vector<2x1x72xf32>,
    %c0_39 = arith.constant 0 : index
    %c17 = arith.constant 17 : index
    %c0_40 = arith.constant 0 : index
    %50 = vector.load %arg10[%c0_39, %c17, %c0_40] : memref<2x18x72xf32, #tpu.memory_space<vmem>>, vector<2x1x72xf32>
    tpu.vector_store %arg10[%c0_39, %c17, %c0_40], %48 {strides = array<i32>} : memref<2x18x72xf32, #tpu.memory_space<vmem>>, vector<2x1x72xf32>,
    %51 = vector.shape_cast %47 : vector<32x72xf32> to vector<2x16x72xf32>
    %c0_41 = arith.constant 0 : index
    %c1_42 = arith.constant 1 : index
    %c0_43 = arith.constant 0 : index
    %52 = vector.load %arg10[%c0_41, %c1_42, %c0_43] : memref<2x18x72xf32, #tpu.memory_space<vmem>>, vector<2x16x72xf32>
    tpu.vector_store %arg10[%c0_41, %c1_42, %c0_43], %51 {strides = array<i32>} : memref<2x18x72xf32, #tpu.memory_space<vmem>>, vector<2x16x72xf32>,
    %c0_44 = arith.constant 0 : index
    %c0_45 = arith.constant 0 : index
    %c0_46 = arith.constant 0 : index
    %53 = vector.load %arg10[%c0_44, %c0_45, %c0_46] : memref<2x18x72xf32, #tpu.memory_space<vmem>>, vector<2x16x72xf32>
    %54 = vector.shape_cast %53 : vector<2x16x72xf32> to vector<32x72xf32>
    %c0_47 = arith.constant 0 : index
    %c0_48 = arith.constant 0 : index
    %c0_49 = arith.constant 0 : index
    %55 = vector.load %arg4[%c0_47, %c0_48, %c0_49] : memref<3x72x72xf32, #tpu.memory_space<vmem>>, vector<1x72x72xf32>
    %56 = vector.shape_cast %55 : vector<1x72x72xf32> to vector<72x72xf32>
    %cst_50 = arith.constant dense<0.000000e+00> : vector<32x72xf32>
    %57 = tpu.matmul %54, %56, %cst_50 {dimension_numbers = #tpu.dot_dimension_numbers<[1], [0], [0], [1], [0, 0, 1, 1], [], []>} : vector<32x72xf32>, vector<72x72xf32>, vector<32x72xf32> -> vector<32x72xf32>
    %c0_51 = arith.constant 0 : index
    %c1_52 = arith.constant 1 : index
    %c0_53 = arith.constant 0 : index
    %58 = vector.load %arg10[%c0_51, %c1_52, %c0_53] : memref<2x18x72xf32, #tpu.memory_space<vmem>>, vector<2x16x72xf32>
    %59 = vector.shape_cast %58 : vector<2x16x72xf32> to vector<32x72xf32>
    %c1_54 = arith.constant 1 : index
    %c0_55 = arith.constant 0 : index
    %c0_56 = arith.constant 0 : index
    %60 = vector.load %arg4[%c1_54, %c0_55, %c0_56] : memref<3x72x72xf32, #tpu.memory_space<vmem>>, vector<1x72x72xf32>
    %61 = vector.shape_cast %60 : vector<1x72x72xf32> to vector<72x72xf32>
    %cst_57 = arith.constant dense<0.000000e+00> : vector<32x72xf32>
    %62 = tpu.matmul %59, %61, %cst_57 {dimension_numbers = #tpu.dot_dimension_numbers<[1], [0], [0], [1], [0, 0, 1, 1], [], []>} : vector<32x72xf32>, vector<72x72xf32>, vector<32x72xf32> -> vector<32x72xf32>
    %63 = arith.addf %57, %62 : vector<32x72xf32>
    %c0_58 = arith.constant 0 : index
    %c2_59 = arith.constant 2 : index
    %c0_60 = arith.constant 0 : index
    %64 = vector.load %arg10[%c0_58, %c2_59, %c0_60] : memref<2x18x72xf32, #tpu.memory_space<vmem>>, vector<2x16x72xf32>
    %65 = vector.shape_cast %64 : vector<2x16x72xf32> to vector<32x72xf32>
    %c2_61 = arith.constant 2 : index
    %c0_62 = arith.constant 0 : index
    %c0_63 = arith.constant 0 : index
    %66 = vector.load %arg4[%c2_61, %c0_62, %c0_63] : memref<3x72x72xf32, #tpu.memory_space<vmem>>, vector<1x72x72xf32>
    %67 = vector.shape_cast %66 : vector<1x72x72xf32> to vector<72x72xf32>
    %cst_64 = arith.constant dense<0.000000e+00> : vector<32x72xf32>
    %68 = tpu.matmul %65, %67, %cst_64 {dimension_numbers = #tpu.dot_dimension_numbers<[1], [0], [0], [1], [0, 0, 1, 1], [], []>} : vector<32x72xf32>, vector<72x72xf32>, vector<32x72xf32> -> vector<32x72xf32>
    %69 = arith.addf %63, %68 : vector<32x72xf32>
    %c0_65 = arith.constant 0 : index
    %c0_66 = arith.constant 0 : index
    %70 = vector.load %arg5[%c0_65, %c0_66] : memref<1x4xf32, #tpu.memory_space<vmem>>, vector<1x4xf32>
    %c0_67 = arith.constant 0 : index
    %c0_68 = arith.constant 0 : index
    %71 = vector.load %arg6[%c0_67, %c0_68] : memref<1x4xf32, #tpu.memory_space<vmem>>, vector<1x4xf32>
    %cst_69 = arith.constant dense<0.000000e+00> : vector<32x4xf32>
    %72 = tpu.matmul %69, %0, %cst_69 {dimension_numbers = #tpu.dot_dimension_numbers<[1], [0], [0], [1], [0, 0, 1, 1], [], []>} : vector<32x72xf32>, vector<72x4xf32>, vector<32x4xf32> -> vector<32x4xf32>
    %cst_70 = arith.constant dense<0.000000e+00> : vector<4xf32>
    %73 = vector.multi_reduction <add>, %72, %cst_70 [0] : vector<32x4xf32> to vector<4xf32>
    %74 = vector.shape_cast %73 : vector<4xf32> to vector<1x4xf32>
    %75 = arith.mulf %69, %69 : vector<32x72xf32>
    %cst_71 = arith.constant dense<0.000000e+00> : vector<32x4xf32>
    %76 = tpu.matmul %75, %0, %cst_71 {dimension_numbers = #tpu.dot_dimension_numbers<[1], [0], [0], [1], [0, 0, 1, 1], [], []>} : vector<32x72xf32>, vector<72x4xf32>, vector<32x4xf32> -> vector<32x4xf32>
    %cst_72 = arith.constant dense<0.000000e+00> : vector<4xf32>
    %77 = vector.multi_reduction <add>, %76, %cst_72 [0] : vector<32x4xf32> to vector<4xf32>
    %78 = vector.shape_cast %77 : vector<4xf32> to vector<1x4xf32>
    %cst_73 = arith.constant 0.001953125 : f32
    %79 = vector.broadcast %cst_73 : f32 to vector<1x4xf32>
    %80 = arith.mulf %74, %79 : vector<1x4xf32>
    %cst_74 = arith.constant 0.001953125 : f32
    %81 = vector.broadcast %cst_74 : f32 to vector<1x4xf32>
    %82 = arith.mulf %78, %81 : vector<1x4xf32>
    %83 = arith.mulf %80, %80 : vector<1x4xf32>
    %84 = arith.subf %82, %83 : vector<1x4xf32>
    %cst_75 = arith.constant 9.99999974E-6 : f32
    %85 = vector.broadcast %cst_75 : f32 to vector<1x4xf32>
    %86 = arith.addf %84, %85 : vector<1x4xf32>
    %87 = math.rsqrt %86 : vector<1x4xf32>
    %88 = arith.mulf %70, %87 : vector<1x4xf32>
    %89 = arith.mulf %80, %88 : vector<1x4xf32>
    %90 = arith.subf %71, %89 : vector<1x4xf32>
    %cst_76 = arith.constant dense<0.000000e+00> : vector<1x72xf32>
    %91 = tpu.matmul %88, %1, %cst_76 {dimension_numbers = #tpu.dot_dimension_numbers<[1], [0], [0], [1], [0, 0, 1, 1], [], []>} : vector<1x4xf32>, vector<4x72xf32>, vector<1x72xf32> -> vector<1x72xf32>
    %cst_77 = arith.constant dense<0.000000e+00> : vector<1x72xf32>
    %92 = tpu.matmul %90, %1, %cst_77 {dimension_numbers = #tpu.dot_dimension_numbers<[1], [0], [0], [1], [0, 0, 1, 1], [], []>} : vector<1x4xf32>, vector<4x72xf32>, vector<1x72xf32> -> vector<1x72xf32>
    %93 = vector.broadcast %91 : vector<1x72xf32> to vector<32x72xf32>
    %94 = arith.mulf %69, %93 : vector<32x72xf32>
    %95 = vector.broadcast %92 : vector<1x72xf32> to vector<32x72xf32>
    %96 = arith.addf %94, %95 : vector<32x72xf32>
    %c0_78 = arith.constant 0 : index
    %c1_79 = arith.constant 1 : index
    %c0_80 = arith.constant 0 : index
    %97 = vector.load %arg0[%c0_78, %c1_79, %c0_80] : memref<2x18x72xf32, #tpu.memory_space<vmem>>, vector<2x16x72xf32>
    %98 = vector.shape_cast %97 : vector<2x16x72xf32> to vector<32x72xf32>
    %99 = arith.addf %96, %98 : vector<32x72xf32>
    %cst_81 = arith.constant 0.000000e+00 : f32
    %100 = vector.broadcast %cst_81 : f32 to vector<32x72xf32>
    %101 = arith.maximumf %99, %100 : vector<32x72xf32>
    %c0_82 = arith.constant 0 : index
    %c0_83 = arith.constant 0 : index
    %102 = vector.load %arg9[%c0_82, %c0_83] : memref<32x72xf32, #tpu.memory_space<vmem>>, vector<32x72xf32>
    tpu.vector_store %arg9[%c0_82, %c0_83], %101 {strides = array<i32>} : memref<32x72xf32, #tpu.memory_space<vmem>>, vector<32x72xf32>,
    return
  }
}

</mosaic_0001>

<bundles_post_ra>
// kernel: tpu_custom_call.1
= control target key start
LH: loop header
LB: loop body
LE: loop exit
PB: predicated region body
PF: predicated region fallthrough
CT: control target
= control target key end

     0   :  { %14 = vsyncpa [#allocation4], 0  ;;  %s1330_s0 = inlined_call_operand.vmem [shape: f32[2,18,72], index: 0, kind: input, shape index: {}]   ;;  %s1331_s1 = inlined_call_operand.hbm [shape: f32[3,72,72], index: 1, kind: input, shape index: {}]   ;;  %s1332_s2 = inlined_call_operand.vmem [shape: f32[1,4], index: 2, kind: input, shape index: {}]   ;;  %s1333_s3 = inlined_call_operand.vmem [shape: f32[1,4], index: 3, kind: input, shape index: {}]   ;;  %s1334_s4 = inlined_call_operand.hbm [shape: f32[3,72,72], index: 4, kind: input, shape index: {}]   ;;  %s1335_s5 = inlined_call_operand.vmem [shape: f32[1,4], index: 5, kind: input, shape index: {}]   ;;  %s1336_s6 = inlined_call_operand.vmem [shape: f32[1,4], index: 6, kind: input, shape index: {}]   ;;  %s1337_s7 = inlined_call_operand.vmem [shape: f32[72,4], index: 7, kind: input, shape index: {}]   ;;  %s1338_s8 = inlined_call_operand.vmem [shape: f32[4,72], index: 8, kind: input, shape index: {}]   ;;  %s1339_s9 = inlined_call_operand.hbm [shape: f32[32,72], index: 9, kind: output, shape index: {}]  }
   0x1   :  { %15 = vsyncpa [#allocation7], 0 }
   0x2   :  { %16 = vsyncpa [#allocation5], 0  ;;  %s23_s11 = sshll.u32 %s1331_s1, 4  ;;  %s978_s12 = smov [#allocation3]   ;;  %s24_s11 = int_to_ptr.hbm [resolvable:$true] %s23_s11 }
   0x3   :  { %s25_s13 = sshll.u32 %s978_s12, 4  ;;  %s40_s16 = sshll.u32 %s1334_s4, 4  ;;  %s26_s13 = int_to_ptr.vmem [resolvable:$true] %s25_s13  ;;  %s41_s16 = int_to_ptr.hbm [resolvable:$true] %s40_s16 }
   0x4   :  { %s979_s17 = smov 128   ;;  %s980_s18 = smov 8  }
   0x5   :  { %31 = dma.hbm_to_vmem [thread:$0]  %s24_s11, 3456, %s26_s13, [#allocation4], %s979_s17, %s979_s17, %s980_s18  }
   0x6   :  { %s981_s19 = smov [#allocation6]  }
   0x7   :  { %s42_s20 = sshll.u32 %s981_s19, 4  ;;  %s43_s20 = int_to_ptr.vmem [resolvable:$true] %s42_s20 }
   0x8   :  { %48 = dma.hbm_to_vmem [thread:$0]  %s41_s16, 3456, %s43_s20, [#allocation7], %s979_s17, %s979_s17, %s980_s18  }
   0x9   :  { %972 = dma.done.wait [#allocation4], 3456  }
   0xa   :  { %973 = vsyncadd [#allocation4], 4294963840 }
   0xb   :  { %974 = dma.done.wait [#allocation7], 3456  }
   0xc   :  { %975 = vsyncadd [#allocation7], 4294963840  ;;  %v198_v0 = vld [vmem:[#allocation3 + $0xd0] sm:$0xff]  ;;  %v197_v1 = vld [vmem:[#allocation3 + $0xc8] sm:$0xff]  ;;  %vm102_vm0 = vcmask 588800   ;;  %vm287_vm1 = vcmask 31744  }
   0xd   :  { %v101_v2 = vld [vmem:[#allocation3 + $0x88] sm:$0xff]  ;;  %218 = vmatpush.msra.mxu2 %v198_v0  ;;  %v87_v3 = vld [vmem:[#allocation3 + $0x40] sm:$0xff]  ;;  %v86_v6 = vld [vmem:[#allocation3 + $0x38] sm:$0xff]  ;;  %vm380_vm2 = vcmask 1043456   ;;  %vm441_vm6 = vcmask 581632   ;;  %s828_s26 = sshll.u32 %s1339_s9, 4  ;;  %s829_s26 = int_to_ptr.hbm [resolvable:$true] %s828_s26 }
   0xe   :  { %122 = vmatpush.msra.mxu0 %v101_v2  ;;  %v100_v4 = vld [vmem:[#allocation3 + $0x80] sm:$0xff]  ;;  %163 = vmatpush.msra.mxu1 %v87_v3  ;;  %v99_v7 = vld [vmem:[#allocation3 + $0x78] sm:$0xff]  ;;  %v85_v8 = vld [vmem:[#allocation3 + $0x30] sm:$0xff] }
   0xf   :  { %v196_v5 = vld [vmem:[#allocation3 + $0xc0] sm:$0xff]  ;;  %219 = vmatpush.msra.mxu2 %v197_v1  ;;  %v195_v9 = vld [vmem:[#allocation3 + $0xb8] sm:$0xff]  ;;  %v98_v10 = vld [vmem:[#allocation3 + $0x70] sm:$0xff] }
  0x10   :  { %123 = vmatpush.msra.mxu0 %v100_v4  ;;  %164 = vmatpush.msra.mxu1 %v86_v6  ;;  %v84_v11 = vld [vmem:[#allocation3 + $0x28] sm:$0xff]  ;;  %v194_v12 = vld [vmem:[#allocation3 + $0xb0] sm:$0xff]  ;;  %v83_v14 = vld [vmem:[#allocation3 + $0x20] sm:$0xff] }
  0x11   :  { %220 = vmatpush.msra.mxu2 %v196_v5  ;;  %v97_v13 = vld [vmem:[#allocation3 + $0x68] sm:$0xff]  ;;  %v96_v16 = vld [vmem:[#allocation3 + $0x60] sm:$0xff]  ;;  %v82_v17 = vld [vmem:[#allocation3 + $0x18] sm:$0xff] }
  0x12   :  { %124 = vmatpush.msra.mxu0 %v99_v7  ;;  %165 = vmatpush.msra.mxu1 %v85_v8  ;;  %v193_v15 = vld [vmem:[#allocation3 + $0xa8] sm:$0xff]  ;;  %v192_v18 = vld [vmem:[#allocation3 + $0xa0] sm:$0xff]  ;;  %v95_v19 = vld [vmem:[#allocation3 + $0x58] sm:$0xff] }
  0x13   :  { %221 = vmatpush.msra.mxu2 %v195_v9  ;;  %v81_v20 = vld [vmem:[#allocation3 + $0x10] sm:$0xff]  ;;  %v191_v21 = vld [vmem:[#allocation3 + $0x98] sm:$0xff]  ;;  %v80_v23 = vld [vmem:[#allocation3 + $0x8] sm:$0xff] }
  0x14   :  { %125 = vmatpush.msra.mxu0 %v98_v10  ;;  %166 = vmatpush.msra.mxu1 %v84_v11  ;;  %v94_v22 = vld [vmem:[#allocation3 + $0x50] sm:$0xff]  ;;  %v1054_v25 = vld [vmem:[%s1337_s7 + $0x38] sm:$0xff]  ;;  %v79_v29 = vld [vmem:[#allocation3] sm:$0xff] }
  0x15   :  { %222 = vmatpush.msra.mxu2 %v194_v12  ;;  %v1049_v24 = vld [vmem:[%s1337_s7 + $0x40] sm:$0xff]  ;;  %v93_v27 = vld [vmem:[#allocation3 + $0x48] sm:$0xff]  ;;  %v1072_v32 = vld [vmem:[%s1337_s7 + $0x30] sm:$0xff] }
  0x16   :  { %126 = vmatpush.msra.mxu0 %v97_v13  ;;  %167 = vmatpush.msra.mxu1 %v83_v14  ;;  %v190_v26 = vld [vmem:[#allocation3 + $0x90] sm:$0xff]  ;;  %v1081_v33 = vld [vmem:[%s1337_s7 + $0x28] sm:$0xff]  ;;  %v1108_v38 = vld [vmem:[%s1337_s7 + $0x18] sm:$0xff] }
  0x17   :  { %223 = vmatpush.msra.mxu2 %v193_v15  ;;  %265 = vmatpush.msra.mxu3 %v1049_v24  ;;  %v185_v28 = vld [vmem:[%s1330_s0 + $0x2] sm:$0xff]  ;;  %v186_v35 = vld [vmem:[%s1330_s0 + $0xa] sm:$0xff]  ;;  %v187_v39 = vld [vmem:[%s1330_s0 + $0x1a] sm:$0xff] }
  0x18   :  { %127 = vmatpush.msra.mxu0 %v96_v16  ;;  %168 = vmatpush.msra.mxu1 %v82_v17  ;;  %v1063_v30 = vld [vmem:[%s1330_s0 + $0x1] sm:$0xff]  ;;  %v1098_v36 = vld [vmem:[%s1330_s0 + $0x9] sm:$0xff]  ;;  %v1124_v40 = vld [vmem:[%s1330_s0 + $0x19] sm:$0xff] }
  0x19   :  { %224 = vmatpush.msra.mxu2 %v192_v18  ;;  %v75_v31 = vld [vmem:[%s1330_s0] sm:$0xff]  ;;  %266 = vmatpush.msra.mxu3 %v1054_v25  ;;  %v76_v37 = vld [vmem:[%s1330_s0 + $0x8] sm:$0xff]  ;;  %v77_v41 = vld [vmem:[%s1330_s0 + $0x18] sm:$0xff] }
  0x1a   :  { %128 = vmatpush.msra.mxu0 %v95_v19  ;;  %169 = vmatpush.msra.mxu1 %v81_v20  ;;  %v1088_v34 = vld [vmem:[%s1337_s7 + $0x20] sm:$0xff]  ;;  %v1151_v45 = vld [vmem:[%s1337_s7 + $0x10] sm:$0xff]  ;;  %v1158_v46 = vld [vmem:[%s1337_s7 + $0x8] sm:$0xff] }
  0x1b   :  { %225 = vmatpush.msra.mxu2 %v191_v21  ;;  %267 = vmatpush.msra.mxu3 %v1072_v32  ;;  %v188_v42 = vld [vmem:[%s1330_s0 + $0x22] sm:$0xff] }
  0x1c   :  { %129 = vmatpush.msra.mxu0 %v94_v22  ;;  %170 = vmatpush.msra.mxu1 %v80_v23  ;;  %v1139_v43 = vld [vmem:[%s1330_s0 + $0x21] sm:$0xff] }
  0x1d   :  { %226 = vmatpush.msra.mxu2 %v190_v26  ;;  %268 = vmatpush.msra.mxu3 %v1081_v33  ;;  %v78_v44 = vld [vmem:[%s1330_s0 + $0x20] sm:$0xff] }
  0x1e   :  { %130 = vmatpush.msra.mxu0 %v93_v27  ;;  %850 = vmatmul.msk.f32.vlgmr.msra.gmra.mxu2 %vm102_vm0, %v185_v28  ;;  %v1165_v47 = vld [vmem:[%s1337_s7] sm:$0xff] }
  0x1f   :  { %171 = vmatpush.msra.mxu1 %v79_v29  ;;  %842 = vmatmul.msk.f32.vlgmr.msra.gmra.mxu0 %vm102_vm0, %v1063_v30  ;;  %v1216_v28 = vld [vmem:[%s1338_s8] sm:$0xf] }
  0x20   :  { %846 = vmatmul.msk.f32.vlgmr.msra.gmra.mxu1 %vm102_vm0, %v75_v31  ;;  %324 = vmatpush.msrb.mxu0 %v1049_v24 }
  0x21   :  { %269 = vmatpush.msra.mxu3 %v1088_v34  ;;  %864 = vmatpush.msk.msrb.mxu2 %vm380_vm2, %v1216_v28 }
  0x22   :  { %325 = vmatpush.msrb.mxu0 %v1054_v25  ;;  %862 = vmatpush.msk.msrb.mxu1 %vm380_vm2, %v1216_v28 }
  0x23   :  { %270 = vmatpush.msra.mxu3 %v1108_v38 }
  0x24   :  { %326 = vmatpush.msrb.mxu0 %v1072_v32 }
  0x25   :  { %271 = vmatpush.msra.mxu3 %v1151_v45 }
  0x26   :  { %851 = vmatmul.msk.f32.gmra.mxu2 %vm102_vm0, %v186_v35  ;;  %327 = vmatpush.msrb.mxu0 %v1081_v33 }
  0x27   :  { %843 = vmatmul.msk.f32.gmra.mxu0 %vm102_vm0, %v1098_v36  ;;  %272 = vmatpush.msra.mxu3 %v1158_v46 }
  0x28   :  { %847 = vmatmul.msk.f32.gmra.mxu1 %vm102_vm0, %v76_v37  ;;  %328 = vmatpush.msrb.mxu0 %v1088_v34 }
  0x29   :  { %273 = vmatpush.msra.mxu3 %v1165_v47 }
  0x2a   :  { %329 = vmatpush.msrb.mxu0 %v1108_v38 }
  0x2c   :  { %330 = vmatpush.msrb.mxu0 %v1151_v45 }
  0x2e   :  { %852 = vmatmul.msk.f32.gmra.mxu2 %vm102_vm0, %v187_v39  ;;  %331 = vmatpush.msrb.mxu0 %v1158_v46 }
  0x2f   :  { %844 = vmatmul.msk.f32.gmra.mxu0 %vm102_vm0, %v1124_v40 }
  0x30   :  { %848 = vmatmul.msk.f32.gmra.mxu1 %vm102_vm0, %v77_v41  ;;  %332 = vmatpush.msrb.mxu0 %v1165_v47 }
  0x32   :  { %639 = vmatpush.msra.mxu0 %v1049_v24 }
  0x34   :  { %640 = vmatpush.msra.mxu0 %v1054_v25 }
  0x36   :  { %853 = vmatmul.msk.f32.gmra.mxu2 %vm102_vm0, %v188_v42  ;;  %641 = vmatpush.msra.mxu0 %v1072_v32 }
  0x37   :  { %845 = vmatmul.msk.f32.gmra.mxu0 %vm102_vm0, %v1139_v43 }
  0x38   :  { %849 = vmatmul.msk.f32.gmra.mxu1 %vm102_vm0, %v78_v44  ;;  %642 = vmatpush.msra.mxu0 %v1081_v33 }
  0x3a   :  { %643 = vmatpush.msra.mxu0 %v1088_v34 }
  0x3c   :  { %644 = vmatpush.msra.mxu0 %v1108_v38 }
  0x3e   :  { %645 = vmatpush.msra.mxu0 %v1151_v45 }
  0x40   :  { %646 = vmatpush.msra.mxu0 %v1158_v46 }
  0x42   :  { %647 = vmatpush.msra.mxu0 %v1165_v47 }
  0x9c   :  { %v132_v48 = vpop.f32.mrf.mxu0 }
  0x9d   :  { %v173_v49 = vpop.f32.mrf.mxu1 }
  0x9e   :  { %v174_v50 = vadd.f32 %v173_v49, %v132_v48 }
  0xa1   :  { %v228_v51 = vpop.f32.mrf.mxu2 }
  0xa2   :  { %v1178_v52 = vadd.f32 %v228_v51, %v174_v50 }
  0xa4   :  { %v301_v53 = vmul.f32 %v1178_v52, %v1178_v52  ;;  %854 = vmatmul.msk.f32.vlgmr.msra.gmra.mxu3 %vm102_vm0, %v1178_v52  ;;  %v135_v54 = vpop.f32.mrf.mxu0 }
  0xa5   :  { %v176_v55 = vpop.f32.mrf.mxu1 }
  0xa6   :  { %858 = vmatmul.msk.f32.vlgmr.msrb.gmra.mxu0 %vm102_vm0, %v301_v53  ;;  %v177_v56 = vadd.f32 %v176_v55, %v135_v54 }
  0xa9   :  { %v231_v57 = vpop.f32.mrf.mxu2 }
  0xaa   :  { %v1185_v58 = vadd.f32 %v231_v57, %v177_v56 }
  0xac   :  { %855 = vmatmul.msk.f32.gmra.mxu3 %vm102_vm0, %v1185_v58  ;;  %v302_v59 = vmul.f32 %v1185_v58, %v1185_v58  ;;  %v138_v60 = vpop.f32.mrf.mxu0 }
  0xad   :  { %v179_v61 = vpop.f32.mrf.mxu1 }
  0xae   :  { %859 = vmatmul.msk.f32.gmra.mxu0 %vm102_vm0, %v302_v59  ;;  %v180_v62 = vadd.f32 %v179_v61, %v138_v60  ;;  %v476_v59 = vld [vmem:[#allocation6 + $0x88] sm:$0xff]  ;;  %v475_v60 = vld [vmem:[#allocation6 + $0x80] sm:$0xff] }
  0xaf   :  { %496 = vmatpush.msrb.mxu3 %v476_v59 }
  0xb1   :  { %v234_v63 = vpop.f32.mrf.mxu2  ;;  %497 = vmatpush.msrb.mxu3 %v475_v60 }
  0xb2   :  { %v1192_v0 = vadd.f32 %v234_v63, %v180_v62 }
  0xb4   :  { %856 = vmatmul.msk.f32.gmra.mxu3 %vm102_vm0, %v1192_v0  ;;  %v303_v1 = vmul.f32 %v1192_v0, %v1192_v0  ;;  %v141_v2 = vpop.f32.mrf.mxu0 }
  0xb5   :  { %v182_v3 = vpop.f32.mrf.mxu1 }
  0xb6   :  { %860 = vmatmul.msk.f32.gmra.mxu0 %vm102_vm0, %v303_v1  ;;  %v183_v4 = vadd.f32 %v182_v3, %v141_v2 }
  0xb9   :  { %v237_v5 = vpop.f32.mrf.mxu2 }
  0xba   :  { %v1199_v6 = vadd.f32 %v237_v5, %v183_v4 }
  0xbc   :  { %857 = vmatmul.msk.f32.gmra.mxu3 %vm102_vm0, %v1199_v6  ;;  %v304_v7 = vmul.f32 %v1199_v6, %v1199_v6 }
  0xbe   :  { %861 = vmatmul.msk.f32.gmra.mxu0 %vm102_vm0, %v304_v7 }
 0x123   :  { %v334_v8 = vpop.f32.mrf.mxu0 }
 0x124   :  { %v346_v15 = vsel %vm287_vm1, %v334_v8, 0.0  ;;  %v244_v8 = vld [vmem:[%s1332_s2] sm:$0x1] }
 0x127   :  { %v275_v9 = vpop.f32.mrf.mxu3 }
 0x128   :  { %v288_v21 = vsel %vm287_vm1, %v275_v9, 0.0 }
 0x12b   :  { %v337_v10 = vpop.f32.mrf.mxu0 }
 0x12c   :  { %v347_v13 = vsel %vm287_vm1, %v337_v10, 0.0 }
 0x12d   :  { %v348_v17 = vadd.f32 %v347_v13, %v346_v15  ;;  %v474_v15 = vld [vmem:[#allocation6 + $0x78] sm:$0xff] }
 0x12e   :  { %498 = vmatpush.msrb.mxu3 %v474_v15 }
 0x12f   :  { %v278_v11 = vpop.f32.mrf.mxu3 }
 0x130   :  { %v289_v18 = vsel %vm287_vm1, %v278_v11, 0.0 }
 0x131   :  { %v290_v26 = vadd.f32 %v289_v18, %v288_v21  ;;  %v572_v18 = vld [vmem:[#allocation6 + $0xd0] sm:$0xff]  ;;  %v571_v21 = vld [vmem:[#allocation6 + $0xc8] sm:$0xff] }
 0x132   :  { %592 = vmatpush.msra.mxu2 %v572_v18 }
 0x133   :  { %v340_v12 = vpop.f32.mrf.mxu0 }
 0x134   :  { %v349_v16 = vsel %vm287_vm1, %v340_v12, 0.0  ;;  %v245_v12 = vld [vmem:[%s1333_s3] sm:$0x1]  ;;  %593 = vmatpush.msra.mxu2 %v571_v21 }
 0x135   :  { %v350_v19 = vadd.f32 %v349_v16, %v348_v17  ;;  %v473_v16 = vld [vmem:[#allocation6 + $0x70] sm:$0xff]  ;;  %v462_v17 = vld [vmem:[#allocation6 + $0x40] sm:$0xff] }
 0x136   :  { %537 = vmatpush.msra.mxu1 %v462_v17  ;;  %499 = vmatpush.msrb.mxu3 %v473_v16 }
 0x137   :  { %v281_v14 = vpop.f32.mrf.mxu3 }
 0x138   :  { %v291_v22 = vsel %vm287_vm1, %v281_v14, 0.0 }
 0x139   :  { %v292_v29 = vadd.f32 %v291_v22, %v290_v26  ;;  %v460_v22 = vld [vmem:[#allocation6 + $0x30] sm:$0xff]  ;;  %v459_v26 = vld [vmem:[#allocation6 + $0x28] sm:$0xff] }
 0x13b   :  { %v343_v20 = vpop.f32.mrf.mxu0 }
 0x13c   :  { %v351_v23 = vsel %vm287_vm1, %v343_v20, 0.0  ;;  %v461_v20 = vld [vmem:[#allocation6 + $0x38] sm:$0xff] }
 0x13d   :  { %v352_v27 = vadd.f32 %v351_v23, %v350_v19  ;;  %v472_v19 = vld [vmem:[#allocation6 + $0x68] sm:$0xff]  ;;  %538 = vmatpush.msra.mxu1 %v461_v20  ;;  %v570_v23 = vld [vmem:[#allocation6 + $0xc0] sm:$0xff] }
 0x13e   :  { %500 = vmatpush.msrb.mxu3 %v472_v19  ;;  %594 = vmatpush.msra.mxu2 %v570_v23 }
 0x13f   :  { %v353_v31 = vrot.slane %v352_v27, 4  ;;  %v284_v35 = vpop.f32.mrf.mxu3  ;;  %539 = vmatpush.msra.mxu1 %v460_v22 }
 0x140   :  { %v293_v37 = vsel %vm287_vm1, %v284_v35, 0.0  ;;  %v471_v35 = vld [vmem:[#allocation6 + $0x60] sm:$0xff] }
 0x141   :  { %v354_v39 = vadd.f32 %v353_v31, %v352_v27  ;;  %v294_v41 = vadd.f32 %v293_v37, %v292_v29  ;;  %v569_v27 = vld [vmem:[#allocation6 + $0xb8] sm:$0xff]  ;;  %540 = vmatpush.msra.mxu1 %v459_v26  ;;  %v458_v29 = vld [vmem:[#allocation6 + $0x20] sm:$0xff]  ;;  %v568_v31 = vld [vmem:[#allocation6 + $0xb0] sm:$0xff]  ;;  %501 = vmatpush.msrb.mxu3 %v471_v35 }
 0x142   :  { %595 = vmatpush.msra.mxu2 %v569_v27  ;;  %v470_v37 = vld [vmem:[#allocation6 + $0x58] sm:$0xff] }
 0x143   :  { %v355_v42 = vrot.slane %v354_v39, 2  ;;  %v295_v44 = vrot.slane %v294_v41, 4  ;;  %541 = vmatpush.msra.mxu1 %v458_v29  ;;  %502 = vmatpush.msrb.mxu3 %v470_v37 }
 0x144   :  { %596 = vmatpush.msra.mxu2 %v568_v31 }
 0x145   :  { %v356_v48 = vadd.f32 %v355_v42, %v354_v39  ;;  %v296_v49 = vadd.f32 %v295_v44, %v294_v41  ;;  %v982_v39 = vmov 0.0   ;;  %v457_v41 = vld [vmem:[#allocation6 + $0x18] sm:$0xff]  ;;  %v567_v42 = vld [vmem:[#allocation6 + $0xa8] sm:$0xff]  ;;  %v456_v44 = vld [vmem:[#allocation6 + $0x10] sm:$0xff] }
 0x146   :  { %442 = vst.msk [vmem:[#allocation2] sm:$0x1] %vm441_vm6, %v982_v39  ;;  %542 = vmatpush.msra.mxu1 %v457_v41  ;;  %597 = vmatpush.msra.mxu2 %v567_v42 }
 0x147   :  { %v297_v50 = vrot.slane %v296_v49, 2  ;;  %v357_v51 = vrot.slane %v356_v48, 1  ;;  %443 = vst.msk [vmem:[#allocation2 + $0x18] sm:$0x1] %vm441_vm6, %v982_v39 }
 0x148   :  { %444 = vst.msk [vmem:[#allocation2 + $0x11] sm:$0x1] %vm441_vm6, %v982_v39  ;;  %543 = vmatpush.msra.mxu1 %v456_v44 }
 0x149   :  { %v298_v53 = vadd.f32 %v297_v50, %v296_v49  ;;  %v358_v55 = vadd.f32 %v357_v51, %v356_v48  ;;  %v469_v48 = vld [vmem:[#allocation6 + $0x50] sm:$0xff]  ;;  %v566_v49 = vld [vmem:[#allocation6 + $0xa0] sm:$0xff]  ;;  %v455_v50 = vld [vmem:[#allocation6 + $0x8] sm:$0xff]  ;;  %445 = vst.msk [vmem:[#allocation2 + $0x29] sm:$0x1] %vm441_vm6, %v982_v39 }
 0x14a   :  { %v565_v51 = vld [vmem:[#allocation6 + $0x98] sm:$0xff]  ;;  %598 = vmatpush.msra.mxu2 %v566_v49  ;;  %503 = vmatpush.msrb.mxu3 %v469_v48 }
 0x14b   :  { %v299_v54 = vrot.slane %v298_v53, 1  ;;  %v360_v61 = vmul.f32 0.001953125, %v358_v55  ;;  %v564_v55 = vld [vmem:[#allocation6 + $0x90] sm:$0xff]  ;;  %544 = vmatpush.msra.mxu1 %v455_v50 }
 0x14c   :  { %599 = vmatpush.msra.mxu2 %v565_v51 }
 0x14d   :  { %v300_v56 = vadd.f32 %v299_v54, %v298_v53  ;;  %v468_v53 = vld [vmem:[#allocation6 + $0x48] sm:$0xff]  ;;  %v454_v54 = vld [vmem:[#allocation6] sm:$0xff] }
 0x14e   :  { %504 = vmatpush.msrb.mxu3 %v468_v53  ;;  %545 = vmatpush.msra.mxu1 %v454_v54 }
 0x14f   :  { %v359_v57 = vmul.f32 0.001953125, %v300_v56  ;;  %600 = vmatpush.msra.mxu2 %v564_v55 }
 0x150   :  { %697 = vmatpush.msra.mxu3 %v1049_v24 }
 0x151   :  { %v361_v62 = vmul.f32 %v359_v57, %v359_v57 }
 0x152   :  { %698 = vmatpush.msra.mxu3 %v1054_v25 }
 0x153   :  { %v362_v63 = vsub.f32 %v360_v61, %v361_v62 }
 0x154   :  { %699 = vmatpush.msra.mxu3 %v1072_v32 }
 0x155   :  { %v363_v1 = vadd.f32 1e-05, %v362_v63 }
 0x156   :  { %700 = vmatpush.msra.mxu3 %v1081_v33 }
 0x157   :  { %896 = vrsqrt.f32 %v363_v1  ;;  %vm370_vm4 = vweird.f32 %v363_v1 }
 0x158   :  { %701 = vmatpush.msra.mxu3 %v1088_v34 }
 0x15a   :  { %702 = vmatpush.msra.mxu3 %v1108_v38 }
 0x15c   :  { %703 = vmatpush.msra.mxu3 %v1151_v45 }
 0x15d   :  { %v897_v2 = vpop.eup %896 }
 0x15e   :  { %v365_v3 = vmul.f32 %v897_v2, %v363_v1  ;;  %vm371_vm3 = vweird.f32 %v897_v2  ;;  %704 = vmatpush.msra.mxu3 %v1158_v46 }
 0x15f   :  { %vm372_vm5 = vmor %vm370_vm4, %vm371_vm3 }
 0x160   :  { %v366_v4 = vmul.f32 %v897_v2, %v365_v3  ;;  %705 = vmatpush.msra.mxu3 %v1165_v47 }
 0x162   :  { %v367_v5 = vmul.f32 0.5, %v366_v4 }
 0x164   :  { %v368_v7 = vsub.f32 1.5, %v367_v5 }
 0x166   :  { %v369_v9 = vmul.f32 %v897_v2, %v368_v7 }
 0x168   :  { %v373_v10 = vsel %vm372_vm5, %v897_v2, %v369_v9 }
 0x169   :  { %v374_v11 = vmul.f32 %v373_v10, %v244_v8 }
 0x16b   :  { %863 = vmatmul.msk.f32.vlgmr.msrb.gmra.mxu1 %vm287_vm1, %v374_v11  ;;  %v375_v13 = vmul.f32 %v374_v11, %v359_v57 }
 0x16c   :  { %886 = vmatpush.msk.msrb.mxu1 %vm380_vm2, %v1216_v28 }
 0x16d   :  { %v376_v14 = vsub.f32 %v245_v12, %v375_v13 }
 0x16f   :  { %865 = vmatmul.msk.f32.vlgmr.msrb.gmra.mxu2 %vm287_vm1, %v376_v14 }
 0x170   :  { %888 = vmatpush.msk.msrb.mxu2 %vm380_vm2, %v1216_v28 }
 0x1e8   :  { %v401_v56 = vpop.f32.mrf.mxu1 }
 0x1e9   :  { %v427_v57 = vperm.slane %v401_v56, 0 }
 0x1eb   :  { %v428_v24 = vmul.f32 %v427_v57, %v1178_v52  ;;  %v429_v60 = vmul.f32 %v427_v57, %v1185_v58  ;;  %v430_v28 = vmul.f32 %v427_v57, %v1192_v0  ;;  %v431_v25 = vmul.f32 %v427_v57, %v1199_v6 }
 0x1f2   :  { %v424_v59 = vpop.f32.mrf.mxu2 }
 0x1f3   :  { %v432_v32 = vperm.slane %v424_v59, 0 }
 0x1f5   :  { %v433_v33 = vadd.f32 %v432_v32, %v428_v24  ;;  %v434_v61 = vadd.f32 %v432_v32, %v429_v60  ;;  %v435_v34 = vadd.f32 %v432_v32, %v430_v28  ;;  %v436_v62 = vadd.f32 %v432_v32, %v431_v25 }
 0x1f7   :  { %v437_v38 = vmax.f32 %v433_v33, 0.0  ;;  %v438_v45 = vmax.f32 %v434_v61, 0.0  ;;  %v439_v63 = vmax.f32 %v435_v34, 0.0  ;;  %v440_v52 = vmax.f32 %v436_v62, 0.0 }
 0x1f9   :  { %446 = vst.msk [vmem:[#allocation2 + $0x1] sm:$0xff] %vm102_vm0, %v437_v38 }
 0x1fa   :  { %447 = vst.msk [vmem:[#allocation2 + $0x9] sm:$0xff] %vm102_vm0, %v438_v45 }
 0x1fb   :  { %448 = vst.msk [vmem:[#allocation2 + $0x19] sm:$0xff] %vm102_vm0, %v439_v63 }
 0x1fc   :  { %449 = vst.msk [vmem:[#allocation2 + $0x21] sm:$0xff] %vm102_vm0, %v440_v52 }
 0x200   :  { %v463_v58 = vld [vmem:[#allocation2 + $0x1] sm:$0xff] }
 0x201   :  { %v450_v46 = vld [vmem:[#allocation2] sm:$0xff]  ;;  %866 = vmatmul.msk.f32.vlgmr.msrb.gmra.mxu3 %vm102_vm0, %v463_v58  ;;  %v464_v47 = vld [vmem:[#allocation2 + $0x9] sm:$0xff] }
 0x202   :  { %870 = vmatmul.msk.f32.vlgmr.msra.gmra.mxu1 %vm102_vm0, %v450_v46  ;;  %v559_v0 = vld [vmem:[#allocation2 + $0x2] sm:$0xff]  ;;  %v560_v1 = vld [vmem:[#allocation2 + $0xa] sm:$0xff]  ;;  %v465_v2 = vld [vmem:[#allocation2 + $0x19] sm:$0xff] }
 0x203   :  { %874 = vmatmul.msk.f32.vlgmr.msra.gmra.mxu2 %vm102_vm0, %v559_v0  ;;  %v451_v6 = vld [vmem:[#allocation2 + $0x8] sm:$0xff]  ;;  %v452_v3 = vld [vmem:[#allocation2 + $0x18] sm:$0xff]  ;;  %v453_v7 = vld [vmem:[#allocation2 + $0x20] sm:$0xff] }
 0x204   :  { %v561_v4 = vld [vmem:[#allocation2 + $0x1a] sm:$0xff]  ;;  %v562_v8 = vld [vmem:[#allocation2 + $0x22] sm:$0xff] }
 0x205   :  { %v466_v5 = vld [vmem:[#allocation2 + $0x21] sm:$0xff] }
 0x209   :  { %867 = vmatmul.msk.f32.gmra.mxu3 %vm102_vm0, %v464_v47 }
 0x20a   :  { %871 = vmatmul.msk.f32.gmra.mxu1 %vm102_vm0, %v451_v6 }
 0x20b   :  { %875 = vmatmul.msk.f32.gmra.mxu2 %vm102_vm0, %v560_v1 }
 0x211   :  { %868 = vmatmul.msk.f32.gmra.mxu3 %vm102_vm0, %v465_v2 }
 0x212   :  { %872 = vmatmul.msk.f32.gmra.mxu1 %vm102_vm0, %v452_v3 }
 0x213   :  { %876 = vmatmul.msk.f32.gmra.mxu2 %vm102_vm0, %v561_v4 }
 0x219   :  { %869 = vmatmul.msk.f32.gmra.mxu3 %vm102_vm0, %v466_v5 }
 0x21a   :  { %873 = vmatmul.msk.f32.gmra.mxu1 %vm102_vm0, %v453_v7 }
 0x21b   :  { %877 = vmatmul.msk.f32.gmra.mxu2 %vm102_vm0, %v562_v8 }
 0x27f   :  { %v547_v9 = vpop.f32.mrf.mxu1 }
 0x284   :  { %v506_v10 = vpop.f32.mrf.mxu3 }
 0x285   :  { %v548_v11 = vadd.f32 %v547_v9, %v506_v10 }
 0x286   :  { %v602_v12 = vpop.f32.mrf.mxu2 }
 0x287   :  { %v1268_v13 = vadd.f32 %v602_v12, %v548_v11  ;;  %v550_v14 = vpop.f32.mrf.mxu1 }
 0x289   :  { %v674_v15 = vmul.f32 %v1268_v13, %v1268_v13  ;;  %878 = vmatmul.msk.f32.vlgmr.msra.gmra.mxu0 %vm102_vm0, %v1268_v13 }
 0x28b   :  { %882 = vmatmul.msk.f32.vlgmr.msra.gmra.mxu3 %vm102_vm0, %v674_v15 }
 0x28c   :  { %v509_v16 = vpop.f32.mrf.mxu3 }
 0x28d   :  { %v551_v17 = vadd.f32 %v550_v14, %v509_v16 }
 0x28e   :  { %v605_v18 = vpop.f32.mrf.mxu2 }
 0x28f   :  { %v1275_v19 = vadd.f32 %v605_v18, %v551_v17  ;;  %v553_v21 = vpop.f32.mrf.mxu1  ;;  %v618_v18 = vld [vmem:[%s1335_s5] sm:$0x1]  ;;  %s983_s5 = smov [#allocation8]  }
 0x291   :  { %879 = vmatmul.msk.f32.gmra.mxu0 %vm102_vm0, %v1275_v19  ;;  %v675_v20 = vmul.f32 %v1275_v19, %v1275_v19 }
 0x293   :  { %883 = vmatmul.msk.f32.gmra.mxu3 %vm102_vm0, %v675_v20 }
 0x294   :  { %v512_v22 = vpop.f32.mrf.mxu3 }
 0x295   :  { %v554_v23 = vadd.f32 %v553_v21, %v512_v22 }
 0x296   :  { %v608_v26 = vpop.f32.mrf.mxu2 }
 0x297   :  { %v1282_v27 = vadd.f32 %v608_v26, %v554_v23  ;;  %v556_v31 = vpop.f32.mrf.mxu1  ;;  %v619_v23 = vld [vmem:[%s1336_s6] sm:$0x1]  ;;  %s826_s6 = sshll.u32 %s983_s5, 4  ;;  %s827_s6 = int_to_ptr.vmem [resolvable:$true] %s826_s6 }
 0x299   :  { %880 = vmatmul.msk.f32.gmra.mxu0 %vm102_vm0, %v1282_v27  ;;  %v676_v29 = vmul.f32 %v1282_v27, %v1282_v27 }
 0x29b   :  { %884 = vmatmul.msk.f32.gmra.mxu3 %vm102_vm0, %v676_v29 }
 0x29c   :  { %v515_v35 = vpop.f32.mrf.mxu3 }
 0x29d   :  { %v557_v37 = vadd.f32 %v556_v31, %v515_v35 }
 0x29e   :  { %v611_v39 = vpop.f32.mrf.mxu2 }
 0x29f   :  { %v1289_v41 = vadd.f32 %v611_v39, %v557_v37 }
 0x2a1   :  { %881 = vmatmul.msk.f32.gmra.mxu0 %vm102_vm0, %v1289_v41  ;;  %v677_v42 = vmul.f32 %v1289_v41, %v1289_v41 }
 0x2a3   :  { %885 = vmatmul.msk.f32.gmra.mxu3 %vm102_vm0, %v677_v42 }
 0x306   :  { %v649_v44 = vpop.f32.mrf.mxu0 }
 0x307   :  { %v661_v54 = vsel %vm287_vm1, %v649_v44, 0.0 }
 0x30e   :  { %v652_v48 = vpop.f32.mrf.mxu0  ;;  %v707_v49 = vpop.f32.mrf.mxu3 }
 0x30f   :  { %v662_v53 = vsel %vm287_vm1, %v652_v48, 0.0  ;;  %v719_v33 = vsel %vm287_vm1, %v707_v49, 0.0 }
 0x310   :  { %v663_v56 = vadd.f32 %v662_v53, %v661_v54 }
 0x316   :  { %v655_v50 = vpop.f32.mrf.mxu0  ;;  %v710_v51 = vpop.f32.mrf.mxu3 }
 0x317   :  { %v664_v55 = vsel %vm287_vm1, %v655_v50, 0.0  ;;  %v720_v25 = vsel %vm287_vm1, %v710_v51, 0.0 }
 0x318   :  { %v665_v57 = vadd.f32 %v664_v55, %v663_v56  ;;  %v721_v34 = vadd.f32 %v720_v25, %v719_v33 }
 0x31e   :  { %v658_v24 = vpop.f32.mrf.mxu0  ;;  %v713_v59 = vpop.f32.mrf.mxu3 }
 0x31f   :  { %v666_v60 = vsel %vm287_vm1, %v658_v24, 0.0  ;;  %v722_v61 = vsel %vm287_vm1, %v713_v59, 0.0 }
 0x320   :  { %v667_v28 = vadd.f32 %v666_v60, %v665_v57  ;;  %v723_v45 = vadd.f32 %v722_v61, %v721_v34 }
 0x322   :  { %v668_v32 = vrot.slane %v667_v28, 4 }
 0x324   :  { %v669_v62 = vadd.f32 %v668_v32, %v667_v28 }
 0x326   :  { %v670_v38 = vrot.slane %v669_v62, 2  ;;  %v716_v63 = vpop.f32.mrf.mxu3 }
 0x327   :  { %v724_v52 = vsel %vm287_vm1, %v716_v63, 0.0 }
 0x328   :  { %v671_v58 = vadd.f32 %v670_v38, %v669_v62  ;;  %v725_v46 = vadd.f32 %v724_v52, %v723_v45 }
 0x32a   :  { %v672_v0 = vrot.slane %v671_v58, 1  ;;  %v726_v47 = vrot.slane %v725_v46, 4 }
 0x32c   :  { %v727_v6 = vadd.f32 %v726_v47, %v725_v46  ;;  %v673_v1 = vadd.f32 %v672_v0, %v671_v58 }
 0x32e   :  { %v728_v2 = vrot.slane %v727_v6, 2  ;;  %v732_v4 = vmul.f32 0.001953125, %v673_v1 }
 0x330   :  { %v729_v3 = vadd.f32 %v728_v2, %v727_v6  ;;  %v734_v8 = vmul.f32 %v732_v4, %v732_v4 }
 0x332   :  { %v730_v5 = vrot.slane %v729_v3, 1 }
 0x334   :  { %v731_v7 = vadd.f32 %v730_v5, %v729_v3 }
 0x336   :  { %v733_v9 = vmul.f32 0.001953125, %v731_v7 }
 0x338   :  { %v735_v10 = vsub.f32 %v733_v9, %v734_v8 }
 0x33a   :  { %v736_v11 = vadd.f32 1e-05, %v735_v10 }
 0x33c   :  { %898 = vrsqrt.f32 %v736_v11  ;;  %vm743_vm8 = vweird.f32 %v736_v11 }
 0x342   :  { %v899_v12 = vpop.eup %898 }
 0x343   :  { %v738_v14 = vmul.f32 %v899_v12, %v736_v11  ;;  %vm744_vm7 = vweird.f32 %v899_v12 }
 0x344   :  { %vm745_vm9 = vmor %vm743_vm8, %vm744_vm7 }
 0x345   :  { %v739_v15 = vmul.f32 %v899_v12, %v738_v14 }
 0x347   :  { %v740_v16 = vmul.f32 0.5, %v739_v15 }
 0x349   :  { %v741_v17 = vsub.f32 1.5, %v740_v16 }
 0x34b   :  { %v742_v20 = vmul.f32 %v899_v12, %v741_v17 }
 0x34d   :  { %v746_v21 = vsel %vm745_vm9, %v899_v12, %v742_v20 }
 0x34e   :  { %v747_v22 = vmul.f32 %v746_v21, %v618_v18 }
 0x350   :  { %887 = vmatmul.msk.f32.vlgmr.msrb.gmra.mxu1 %vm287_vm1, %v747_v22  ;;  %v748_v26 = vmul.f32 %v747_v22, %v732_v4 }
 0x352   :  { %v749_v29 = vsub.f32 %v619_v23, %v748_v26 }
 0x354   :  { %889 = vmatmul.msk.f32.vlgmr.msrb.gmra.mxu2 %vm287_vm1, %v749_v29 }
 0x3cd   :  { %v770_v31 = vpop.f32.mrf.mxu1 }
 0x3ce   :  { %v796_v35 = vperm.slane %v770_v31, 0 }
 0x3d0   :  { %v797_v37 = vmul.f32 %v796_v35, %v1268_v13  ;;  %v798_v42 = vmul.f32 %v796_v35, %v1275_v19  ;;  %v799_v44 = vmul.f32 %v796_v35, %v1282_v27  ;;  %v800_v48 = vmul.f32 %v796_v35, %v1289_v41 }
 0x3d7   :  { %v793_v39 = vpop.f32.mrf.mxu2 }
 0x3d8   :  { %v801_v49 = vperm.slane %v793_v39, 0 }
 0x3da   :  { %v802_v50 = vadd.f32 %v801_v49, %v797_v37  ;;  %v803_v51 = vadd.f32 %v801_v49, %v798_v42  ;;  %v804_v53 = vadd.f32 %v801_v49, %v799_v44  ;;  %v805_v54 = vadd.f32 %v801_v49, %v800_v48 }
 0x3dc   :  { %v810_v55 = vadd.f32 %v802_v50, %v1063_v30  ;;  %v811_v56 = vadd.f32 %v803_v51, %v1098_v36  ;;  %v812_v57 = vadd.f32 %v804_v53, %v1124_v40  ;;  %v813_v13 = vadd.f32 %v805_v54, %v1139_v43 }
 0x3de   :  { %v814_v24 = vmax.f32 %v810_v55, 0.0  ;;  %v815_v59 = vmax.f32 %v811_v56, 0.0  ;;  %v816_v19 = vmax.f32 %v812_v57, 0.0  ;;  %v817_v27 = vmax.f32 %v813_v13, 0.0 }
 0x3e0   :  { %818 = vst.msk [vmem:[#allocation8] sm:$0xff] %vm102_vm0, %v814_v24 }
 0x3e1   :  { %819 = vst.msk [vmem:[#allocation8 + $0x8] sm:$0xff] %vm102_vm0, %v815_v59 }
 0x3e2   :  { %820 = vst.msk [vmem:[#allocation8 + $0x10] sm:$0xff] %vm102_vm0, %v816_v19 }
 0x3e3   :  { %821 = vst.msk [vmem:[#allocation8 + $0x18] sm:$0xff] %vm102_vm0, %v817_v27 }
 0x3e4   :  { %834 = dma.vmem_to_hbm [thread:$0]  %s827_s6, 512, %s829_s26, [#allocation5], %s979_s17, %s979_s17, %s980_s18  }
 0x3e5   :  { %976 = dma.done.wait [#allocation5], 512  }
 0x3e6   :  { %977 = vsyncadd [#allocation5], 4294966784 }
 0x3e7   :  { %839 = vsyncpa [#allocation4], 1 }
 0x3e8   :  { %840 = vsyncpa [#allocation7], 1 }
 0x3e9   :  { %841 = vsyncpa [#allocation5], 1 }

</bundles_post_ra>
